<compile_context>
chip_gen: v7x
topology: tpu7x:2x2x1
jax: 0.10.0
libtpu: 0.0.40
codegen_flags: <defaults>
</compile_context>

<pallas_src>
import jax
import jax.numpy as jnp
from jax.experimental import pallas as pl
from jax.experimental.pallas import tpu as pltpu


# ----------------------------------------------------------------------------
# Pallas kernel: fused 3-layer MLP  y = L2( silu( L1( silu( L0(x) ) ) ) )
#   Li(h) = h @ Wi' + bi'   (Wi' block-diag, bf16, shape (P*in, P*out);
#                            bi' f32, shape (1, P*out))
# ----------------------------------------------------------------------------
def biomlp_kernel(x_ref,
                  w0_ref, b0_ref,
                  w1_ref, b1_ref,
                  w2_ref, b2_ref,
                  o_ref):
    # layer 0 + SiLU (bf16 matmul, f32 accumulate / bias / activation)
    h = jnp.dot(x_ref[...].astype(jnp.bfloat16), w0_ref[...],
                preferred_element_type=jnp.float32) + b0_ref[...]
    h = h * jax.nn.sigmoid(h)

    # layer 1 + SiLU
    h = jnp.dot(h.astype(jnp.bfloat16), w1_ref[...],
                preferred_element_type=jnp.float32) + b1_ref[...]
    h = h * jax.nn.sigmoid(h)

    # layer 2 (no activation)
    h = jnp.dot(h.astype(jnp.bfloat16), w2_ref[...],
                preferred_element_type=jnp.float32) + b2_ref[...]

    o_ref[...] = h.astype(o_ref.dtype)


def default_pack_rows():
    """Pack 16 rows per lane group on v6e/v7x (K=256 MXU), 8 on v5-gen."""
    try:
        kind = jax.devices()[0].device_kind.lower()
    except Exception:
        return 16
    return 8 if "v5" in kind else 16


def biomlp_pallas(x_flat, kparams, *, pack, tile_rows=512):
    """x_flat: (N, in_dim) f32.  kparams: perm-folded, block-diag, bf16 W."""
    n, in_dim = x_flat.shape
    w0, b0 = kparams["w0"], kparams["b0"]
    w1, b1 = kparams["w1"], kparams["b1"]
    w2, b2 = kparams["w2"], kparams["b2"]
    pk_in, pk_h0 = w0.shape
    pk_h1 = w1.shape[1]
    pk_out = w2.shape[1]
    out_dim = pk_out // pack

    # Pad rows only to a multiple of `pack` (at most pack-1 rows) so the
    # lane-packing reshape is legal; NOT to tile multiples.
    n_grp = pl.cdiv(n, pack)
    n_rows_packed = n_grp * pack
    if n_rows_packed != n:
        x_flat = jnp.pad(x_flat, ((0, n_rows_packed - n), (0, 0)))
    xp = x_flat.reshape(n_grp, pack * in_dim)   # contiguous row-major: free

    # Tile selection: biggest 8-aligned tile, but keep >= 2 grid steps when
    # the problem is big enough (lets v7x shard across both TensorCores).
    # Ragged last block handled by Pallas OOB masking (cdiv grid).
    if n_grp <= 8:
        tile = n_grp                 # block == full extent (allowed)
    else:
        tile = min(tile_rows, pl.cdiv(n_grp, 2))
        tile = max(8, (tile // 8) * 8)
    grid = (pl.cdiv(n_grp, tile),)

    full = lambda a: pl.BlockSpec(a.shape, lambda i: (0,) * a.ndim)

    weight_bytes = sum(int(a.size) * a.dtype.itemsize
                       for a in (w0, b0, w1, b1, w2, b2))
    cost = pl.CostEstimate(
        flops=2 * n_grp * (pk_in * pk_h0 + pk_h0 * pk_h1 + pk_h1 * pk_out),
        transcendentals=2 * n_grp * (pk_h0 + pk_h1),   # sigmoid ~ exp + recip
        bytes_accessed=n_grp * (pk_in + pk_out) * 4 + weight_bytes,
    )

    y = pl.pallas_call(
        biomlp_kernel,
        out_shape=jax.ShapeDtypeStruct((n_grp, pk_out), jnp.float32),
        grid_spec=pltpu.PrefetchScalarGridSpec(
            num_scalar_prefetch=0,
            grid=grid,
            in_specs=[
                pl.BlockSpec((tile, pk_in), lambda i: (i, 0)),   # packed x rows
                full(w0), full(b0),                              # layer 0
                full(w1), full(b1),                              # layer 1
                full(w2), full(b2),                              # layer 2
            ],
            out_specs=pl.BlockSpec((tile, pk_out), lambda i: (i, 0)),
        ),
        compiler_params=pltpu.CompilerParams(
            dimension_semantics=("parallel",),
        ),
        cost_estimate=cost,
    )(xp, w0, b0, w1, b1, w2, b2)

    # Un-pack lanes back to rows (contiguous reshape); drop pack-pad rows only
    # if any were added.
    y = y.reshape(n_rows_packed, out_dim)
    return y[:n] if n_rows_packed != n else y


# ----------------------------------------------------------------------------
# Parameter setup (mirrors BioMLP.__init__; PyTorch Linear is (out,in), we
# store (in,out)).  in_perm / out_perm are identity at init, as in PyTorch.
# ----------------------------------------------------------------------------
def init_biomlp_params(key, shp):
    params = {}
    keys = jax.random.split(key, 2 * (len(shp) - 1))
    for i in range(len(shp) - 1):
        fan_in, fan_out = shp[i], shp[i + 1]
        bound = 1.0 / jnp.sqrt(fan_in)
        w = jax.random.uniform(keys[2 * i], (fan_out, fan_in),
                               minval=-bound, maxval=bound, dtype=jnp.float32)
        b = jax.random.uniform(keys[2 * i + 1], (fan_out,),
                               minval=-bound, maxval=bound, dtype=jnp.float32)
        params[f"w{i}"] = jnp.asarray(w.T)               # (in, out), f32
        params[f"b{i}"] = jnp.asarray(b).reshape(1, -1)  # (1, out),  f32
    params["in_perm"] = jnp.arange(shp[0], dtype=jnp.float32)
    params["out_perm"] = jnp.arange(shp[-1], dtype=jnp.float32)
    return params


def prepare_kernel_params(params, shp, *, pack):
    """Fold perms into first/last layers, build block-diag bf16 weights.

    x[:, p] @ W        == x @ W[argsort(p), :]
    (h @ W + b)[:, q]  == h @ W[:, q] + b[:, q],  q = argsort(out_perm)
    Block-diag:  W' = kron(I_pack, W),  b' = tile(b, pack)
    # TODO(synk): folding assumes in_fold == out_fold == 1 (true for this module config).
    """
    depth = len(shp) - 1
    in_perm_inv = jnp.argsort(params["in_perm"].astype(jnp.int32))
    out_perm_inv = jnp.argsort(params["out_perm"].astype(jnp.int32))
    eye = jnp.eye(pack, dtype=jnp.float32)

    kparams = {}
    for i in range(depth):
        w = params[f"w{i}"]
        b = params[f"b{i}"]
        if i == 0:
            w = w[in_perm_inv, :]
        if i == depth - 1:
            w = w[:, out_perm_inv]
            b = b[:, out_perm_inv]
        kparams[f"w{i}"] = jnp.kron(eye, w).astype(jnp.bfloat16)     # (P*in, P*out)
        kparams[f"b{i}"] = jnp.tile(b, (1, pack)).astype(jnp.float32)
    return kparams


# ----------------------------------------------------------------------------
# Full forward (matches BioMLP.forward semantics; perms folded into weights)
# ----------------------------------------------------------------------------
def biomlp_forward(x, kparams, *, pack, tile_rows=512):
    rearranged = x.ndim > 2
    if rearranged:
        B, T, d = x.shape
        x = x.reshape(B * T, d)
    y = biomlp_pallas(x, kparams, pack=pack, tile_rows=tile_rows)
    if rearranged:
        y = y.reshape(B, T, -1)
    return y


# pure-JAX f32 reference mirroring the PyTorch forward (runtime permutations)
def biomlp_reference(x, params, shp):
    out_dim = shp[-1]
    orig_shape = x.shape
    if x.ndim > 2:
        x = x.reshape(-1, x.shape[-1])
    n, d = x.shape
    in_perm = params["in_perm"].astype(jnp.int32)
    h = x.reshape(n, 1, d)[:, :, in_perm].reshape(n, d)   # in_fold == 1
    depth = len(shp) - 1
    for i in range(depth - 1):
        h = h @ params[f"w{i}"] + params[f"b{i}"]
        h = h * jax.nn.sigmoid(h)
    h = h @ params[f"w{depth-1}"] + params[f"b{depth-1}"]
    out_perm = params["out_perm"].astype(jnp.int32)
    out_perm_inv = jnp.zeros((out_dim,), dtype=jnp.int32).at[out_perm].set(
        jnp.arange(out_dim, dtype=jnp.int32))
    h = h[:, out_perm_inv]
    if len(orig_shape) > 2:
        h = h.reshape(orig_shape[0], orig_shape[1], out_dim)
    return h


if __name__ == "__main__":
    # Shapes consistent with the module: BioMLP(shp=[16, 32, 32, 8]).
    shp = [16, 32, 32, 8]
    pack = default_pack_rows()

    key = jax.random.PRNGKey(0)
    k_param, k_x1, k_x2 = jax.random.split(key, 3)
    params = init_biomlp_params(k_param, shp)
    kparams = prepare_kernel_params(params, shp, pack=pack)

    # Case 1: (B, T, d) = (2, 8, 16) -> 16 rows, single packed tile.
    x1 = jax.random.normal(k_x1, (2, 8, shp[0]), dtype=jnp.float32)
    y1 = jax.block_until_ready(biomlp_forward(x1, kparams, pack=pack))
    y1_ref = biomlp_reference(x1, params, shp)
    assert y1.shape == (2, 8, shp[-1])
    # bf16 matmul inputs vs f32 reference -> slightly looser tolerance.
    assert jnp.allclose(y1, y1_ref, atol=3e-2, rtol=3e-2), "case 1 mismatch"

    # Case 2: row count not a multiple of pack/tile -> exercises the
    # pack-pad path and the ragged (OOB-masked) last grid block.
    x2 = jax.random.normal(k_x2, (2, 100, shp[0]), dtype=jnp.float32)
    y2 = jax.block_until_ready(biomlp_forward(x2, kparams, pack=pack))
    y2_ref = biomlp_reference(x2, params, shp)
    assert y2.shape == (2, 100, shp[-1])
    assert jnp.allclose(y2, y2_ref, atol=3e-2, rtol=3e-2), "case 2 mismatch"

    print("KERNEL_OK")
</pallas_src>

<mosaic_0001>
module attributes {stable_mosaic.version = 11 : i64} {
  func.func @biomlp_kernel(%arg0: i32, %arg1: memref<1x256xf32, #tpu.memory_space<vmem>>, %arg2: memref<256x512xbf16, #tpu.memory_space<vmem>>, %arg3: memref<1x512xf32, #tpu.memory_space<vmem>>, %arg4: memref<512x512xbf16, #tpu.memory_space<vmem>>, %arg5: memref<1x512xf32, #tpu.memory_space<vmem>>, %arg6: memref<512x128xbf16, #tpu.memory_space<vmem>>, %arg7: memref<1x128xf32, #tpu.memory_space<vmem>>, %arg8: memref<1x128xf32, #tpu.memory_space<vmem>>) attributes {dimension_semantics = [#tpu.dimension_semantics<parallel>], iteration_bounds = array<i64: 1>, scalar_prefetch = 0 : i64, scratch_operands = 0 : i64, tpu.core_type = #tpu.core_type<tc>, window_params = [{transform_indices = @transform_0, window_bounds = array<i64: 1, 256>}, {pipeline_mode = #tpu.pipeline_mode<synchronous>, transform_indices = @transform_1, window_bounds = array<i64: 256, 512>}, {pipeline_mode = #tpu.pipeline_mode<synchronous>, transform_indices = @transform_2, window_bounds = array<i64: 1, 512>}, {pipeline_mode = #tpu.pipeline_mode<synchronous>, transform_indices = @transform_3, window_bounds = array<i64: 512, 512>}, {pipeline_mode = #tpu.pipeline_mode<synchronous>, transform_indices = @transform_4, window_bounds = array<i64: 1, 512>}, {pipeline_mode = #tpu.pipeline_mode<synchronous>, transform_indices = @transform_5, window_bounds = array<i64: 512, 128>}, {pipeline_mode = #tpu.pipeline_mode<synchronous>, transform_indices = @transform_6, window_bounds = array<i64: 1, 128>}, {transform_indices = @transform_7, window_bounds = array<i64: 1, 128>}]} {
    %c0 = arith.constant 0 : index
    %c0_0 = arith.constant 0 : index
    %0 = vector.load %arg1[%c0, %c0_0] : memref<1x256xf32, #tpu.memory_space<vmem>>, vector<1x256xf32>
    %1 = arith.truncf %0 : vector<1x256xf32> to vector<1x256xbf16>
    %c0_1 = arith.constant 0 : index
    %c0_2 = arith.constant 0 : index
    %2 = vector.load %arg2[%c0_1, %c0_2] : memref<256x512xbf16, #tpu.memory_space<vmem>>, vector<256x512xbf16>
    %cst = arith.constant dense<0.000000e+00> : vector<1x512xf32>
    %3 = tpu.matmul %1, %2, %cst {dimension_numbers = #tpu.dot_dimension_numbers<[1], [0], [0], [1], [0, 0, 1, 1], [], []>} : vector<1x256xbf16>, vector<256x512xbf16>, vector<1x512xf32> -> vector<1x512xf32>
    %c0_3 = arith.constant 0 : index
    %c0_4 = arith.constant 0 : index
    %4 = vector.load %arg3[%c0_3, %c0_4] : memref<1x512xf32, #tpu.memory_space<vmem>>, vector<1x512xf32>
    %5 = arith.addf %3, %4 : vector<1x512xf32>
    %6 = arith.negf %5 : vector<1x512xf32>
    %7 = math.exp %6 : vector<1x512xf32>
    %cst_5 = arith.constant 1.000000e+00 : f32
    %8 = vector.broadcast %cst_5 : f32 to vector<1x512xf32>
    %9 = arith.addf %8, %7 : vector<1x512xf32>
    %10 = arith.divf %8, %9 : vector<1x512xf32>
    %11 = arith.mulf %5, %10 : vector<1x512xf32>
    %12 = arith.truncf %11 : vector<1x512xf32> to vector<1x512xbf16>
    %c0_6 = arith.constant 0 : index
    %c0_7 = arith.constant 0 : index
    %13 = vector.load %arg4[%c0_6, %c0_7] : memref<512x512xbf16, #tpu.memory_space<vmem>>, vector<512x512xbf16>
    %cst_8 = arith.constant dense<0.000000e+00> : vector<1x512xf32>
    %14 = tpu.matmul %12, %13, %cst_8 {dimension_numbers = #tpu.dot_dimension_numbers<[1], [0], [0], [1], [0, 0, 1, 1], [], []>} : vector<1x512xbf16>, vector<512x512xbf16>, vector<1x512xf32> -> vector<1x512xf32>
    %c0_9 = arith.constant 0 : index
    %c0_10 = arith.constant 0 : index
    %15 = vector.load %arg5[%c0_9, %c0_10] : memref<1x512xf32, #tpu.memory_space<vmem>>, vector<1x512xf32>
    %16 = arith.addf %14, %15 : vector<1x512xf32>
    %17 = arith.negf %16 : vector<1x512xf32>
    %18 = math.exp %17 : vector<1x512xf32>
    %cst_11 = arith.constant 1.000000e+00 : f32
    %19 = vector.broadcast %cst_11 : f32 to vector<1x512xf32>
    %20 = arith.addf %19, %18 : vector<1x512xf32>
    %21 = arith.divf %19, %20 : vector<1x512xf32>
    %22 = arith.mulf %16, %21 : vector<1x512xf32>
    %23 = arith.truncf %22 : vector<1x512xf32> to vector<1x512xbf16>
    %c0_12 = arith.constant 0 : index
    %c0_13 = arith.constant 0 : index
    %24 = vector.load %arg6[%c0_12, %c0_13] : memref<512x128xbf16, #tpu.memory_space<vmem>>, vector<512x128xbf16>
    %cst_14 = arith.constant dense<0.000000e+00> : vector<1x128xf32>
    %25 = tpu.matmul %23, %24, %cst_14 {dimension_numbers = #tpu.dot_dimension_numbers<[1], [0], [0], [1], [0, 0, 1, 1], [], []>} : vector<1x512xbf16>, vector<512x128xbf16>, vector<1x128xf32> -> vector<1x128xf32>
    %c0_15 = arith.constant 0 : index
    %c0_16 = arith.constant 0 : index
    %26 = vector.load %arg7[%c0_15, %c0_16] : memref<1x128xf32, #tpu.memory_space<vmem>>, vector<1x128xf32>
    %27 = arith.addf %25, %26 : vector<1x128xf32>
    %c0_17 = arith.constant 0 : index
    %c0_18 = arith.constant 0 : index
    %28 = vector.load %arg8[%c0_17, %c0_18] : memref<1x128xf32, #tpu.memory_space<vmem>>, vector<1x128xf32>
    tpu.vector_store %arg8[%c0_17, %c0_18], %27 {strides = array<i32>} : memref<1x128xf32, #tpu.memory_space<vmem>>, vector<1x128xf32>,
    return
  }
  func.func @transform_0(%arg0: i32) -> (i32, i32) {
    %c0_i32 = arith.constant 0 : i32
    %c0_i32_0 = arith.constant 0 : i32
    return %arg0, %c0_i32 : i32, i32
  }
  func.func @transform_1(%arg0: i32) -> (i32, i32) {
    %c0_i32 = arith.constant 0 : i32
    %c0_i32_0 = arith.constant 0 : i32
    %c0_i32_1 = arith.constant 0 : i32
    return %c0_i32, %c0_i32_0 : i32, i32
  }
  func.func @transform_2(%arg0: i32) -> (i32, i32) {
    %c0_i32 = arith.constant 0 : i32
    %c0_i32_0 = arith.constant 0 : i32
    %c0_i32_1 = arith.constant 0 : i32
    return %c0_i32, %c0_i32_0 : i32, i32
  }
  func.func @transform_3(%arg0: i32) -> (i32, i32) {
    %c0_i32 = arith.constant 0 : i32
    %c0_i32_0 = arith.constant 0 : i32
    %c0_i32_1 = arith.constant 0 : i32
    return %c0_i32, %c0_i32_0 : i32, i32
  }
  func.func @transform_4(%arg0: i32) -> (i32, i32) {
    %c0_i32 = arith.constant 0 : i32
    %c0_i32_0 = arith.constant 0 : i32
    %c0_i32_1 = arith.constant 0 : i32
    return %c0_i32, %c0_i32_0 : i32, i32
  }
  func.func @transform_5(%arg0: i32) -> (i32, i32) {
    %c0_i32 = arith.constant 0 : i32
    %c0_i32_0 = arith.constant 0 : i32
    %c0_i32_1 = arith.constant 0 : i32
    return %c0_i32, %c0_i32_0 : i32, i32
  }
  func.func @transform_6(%arg0: i32) -> (i32, i32) {
    %c0_i32 = arith.constant 0 : i32
    %c0_i32_0 = arith.constant 0 : i32
    %c0_i32_1 = arith.constant 0 : i32
    return %c0_i32, %c0_i32_0 : i32, i32
  }
  func.func @transform_7(%arg0: i32) -> (i32, i32) {
    %c0_i32 = arith.constant 0 : i32
    %c0_i32_0 = arith.constant 0 : i32
    return %arg0, %c0_i32 : i32, i32
  }
}

</mosaic_0001>

<bundles_post_ra>
// kernel: tpu_custom_call.1
= control target key start
LH: loop header
LB: loop body
LE: loop exit
PB: predicated region body
PF: predicated region fallthrough
CT: control target
= control target key end

     0   :  { %12 = vsyncpa [#allocation3], 0  ;;  %s2884_s0 = inlined_call_operand.hbm [shape: f32[1,256], index: 0, kind: input, shape index: {}]   ;;  %s2885_s1 = inlined_call_operand.hbm [shape: bf16[256,512], index: 1, kind: input, shape index: {}]   ;;  %s2886_s2 = inlined_call_operand.vmem [shape: f32[1,512], index: 2, kind: input, shape index: {}]   ;;  %s2887_s3 = inlined_call_operand.hbm [shape: bf16[512,512], index: 3, kind: input, shape index: {}]   ;;  %s2888_s4 = inlined_call_operand.vmem [shape: f32[1,512], index: 4, kind: input, shape index: {}]   ;;  %s2889_s5 = inlined_call_operand.hbm [shape: bf16[512,128], index: 5, kind: input, shape index: {}]   ;;  %s2890_s6 = inlined_call_operand.vmem [shape: f32[1,128], index: 6, kind: input, shape index: {}]   ;;  %s2891_s7 = inlined_call_operand.hbm [shape: f32[1,128], index: 7, kind: output, shape index: {}]  }
   0x1   :  { %13 = vsyncpa [#allocation6], 0 }
   0x2   :  { %14 = vsyncpa [#allocation9], 0 }
   0x3   :  { %15 = vsyncpa [#allocation4], 0  ;;  %s2723_s24 = smov [#allocation5]   ;;  %s2605_s28 = scalar_lea.hbm %s2885_s1, 8192 }
   0x4   :  { %s31_s25 = sshll.u32 %s2723_s24, 4  ;;  %p2606_p0 = scmp.ne.s32.totalorder %s2885_s1, %s2605_s28  ;;  %s32_s25 = int_to_ptr.vmem [resolvable:$true] %s31_s25 }
   0x5   :  { %p2609_p1 = scmp.lt.u32.totalorder %s2605_s28, %s2885_s1 }
   0x7   :  { %p2611_p2 = pnand %p2609_p1, %p2606_p0 }
   0x9   :  { %2614 = shalt.err (!%p2611_p2)
}
   0xa   :  { %s2615_s10 = scalar_lea.vmem %s32_s25, 8192  ;;  %p2620_p4 = scmp.lt.s32.totalorder %s32_s25, %s32_s25 }
   0xb   :  { %p2616_p3 = scmp.ne.s32.totalorder %s32_s25, %s2615_s10  ;;  %p2621_p5 = scmp.lt.s32.totalorder %s2615_s10, %s2615_s10 }
   0xd   :  { %p2622_p6 = por %p2621_p5, %p2620_p4 }
   0xf   :  { %p2623_p7 = pnand %p2622_p6, %p2616_p3 }
  0x11   :  { %2626 = shalt.err (!%p2623_p7)
}
  0x12   :  { %s2724_s11 = smov 256   ;;  %s2725_s12 = smov 16  }
  0x13   :  { %37 = dma.hbm_to_vmem [thread:$0]  %s2885_s1, 8192, %s32_s25, [#allocation6], %s2724_s11, %s2724_s11, %s2725_s12  }
  0x14   :  { %s2726_s15 = smov [#allocation2]   ;;  %s2727_s17 = smov [#allocation7]  }
  0x15   :  { %s22_s16 = sshll.u32 %s2726_s15, 4  ;;  %s45_s18 = sshll.u32 %s2727_s17, 4  ;;  %s23_s16 = int_to_ptr.vmem [resolvable:$true] %s22_s16  ;;  %s46_s18 = int_to_ptr.vmem [resolvable:$true] %s45_s18 }
  0x16   :  { %s2627_s21 = scalar_lea.hbm %s2884_s0, 32 }
  0x17   :  { %p2628_p8 = scmp.ne.s32.totalorder %s2884_s0, %s2627_s21  ;;  %p2631_p9 = scmp.lt.u32.totalorder %s2627_s21, %s2884_s0 }
  0x19   :  { %p2633_p10 = pnand %p2631_p9, %p2628_p8 }
  0x1b   :  { %2636 = shalt.err (!%p2633_p10)
}
  0x1c   :  { %s2637_s1 = scalar_lea.vmem %s23_s16, 32  ;;  %p2642_p12 = scmp.lt.s32.totalorder %s23_s16, %s23_s16 }
  0x1d   :  { %p2638_p11 = scmp.ne.s32.totalorder %s23_s16, %s2637_s1  ;;  %p2643_p13 = scmp.lt.s32.totalorder %s2637_s1, %s2637_s1 }
  0x1f   :  { %p2644_p0 = por %p2643_p13, %p2642_p12 }
  0x21   :  { %p2645_p1 = pnand %p2644_p0, %p2638_p11 }
  0x23   :  { %2648 = shalt.err (!%p2645_p1)
}
  0x24   :  { %25 = dma.hbm_to_vmem [thread:$0]  %s2884_s0, 32, %s23_s16, [#allocation3]  }
  0x25   :  { %s2649_s30 = scalar_lea.hbm %s2887_s3, 16384 }
  0x26   :  { %p2650_p2 = scmp.ne.s32.totalorder %s2887_s3, %s2649_s30  ;;  %p2653_p3 = scmp.lt.u32.totalorder %s2649_s30, %s2887_s3 }
  0x28   :  { %p2655_p4 = pnand %p2653_p3, %p2650_p2 }
  0x2a   :  { %2658 = shalt.err (!%p2655_p4)
}
  0x2b   :  { %s2659_s14 = scalar_lea.vmem %s46_s18, 16384  ;;  %p2664_p6 = scmp.lt.s32.totalorder %s46_s18, %s46_s18 }
  0x2c   :  { %p2660_p5 = scmp.ne.s32.totalorder %s46_s18, %s2659_s14  ;;  %p2665_p7 = scmp.lt.s32.totalorder %s2659_s14, %s2659_s14 }
  0x2e   :  { %p2666_p8 = por %p2665_p7, %p2664_p6 }
  0x30   :  { %p2667_p9 = pnand %p2666_p8, %p2660_p5 }
  0x32   :  { %2670 = shalt.err (!%p2667_p9)
}
  0x33   :  { %51 = dma.hbm_to_vmem [thread:$0]  %s2887_s3, 16384, %s46_s18, [#allocation6], %s2724_s11, %s2724_s11, %s2725_s12  }
  0x34   :  { %s2728_s16 = smov [#allocation8]   ;;  %s2671_s21 = scalar_lea.hbm %s2889_s5, 4096 }
  0x35   :  { %s59_s17 = sshll.u32 %s2728_s16, 4  ;;  %p2672_p10 = scmp.ne.s32.totalorder %s2889_s5, %s2671_s21  ;;  %s60_s17 = int_to_ptr.vmem [resolvable:$true] %s59_s17 }
  0x36   :  { %p2675_p11 = scmp.lt.u32.totalorder %s2671_s21, %s2889_s5 }
  0x38   :  { %p2677_p12 = pnand %p2675_p11, %p2672_p10 }
  0x3a   :  { %2680 = shalt.err (!%p2677_p12)
}
  0x3b   :  { %s2681_s1 = scalar_lea.vmem %s60_s17, 4096  ;;  %p2686_p0 = scmp.lt.s32.totalorder %s60_s17, %s60_s17 }
  0x3c   :  { %p2682_p13 = scmp.ne.s32.totalorder %s60_s17, %s2681_s1  ;;  %p2687_p1 = scmp.lt.s32.totalorder %s2681_s1, %s2681_s1 }
  0x3e   :  { %p2688_p2 = por %p2687_p1, %p2686_p0 }
  0x40   :  { %p2689_p3 = pnand %p2688_p2, %p2682_p13 }
  0x42   :  { %2692 = shalt.err (!%p2689_p3)
}
  0x43   :  { %s2729_s3 = smov 64   ;;  %s2730_s11 = smov 4  }
  0x44   :  { %65 = dma.hbm_to_vmem [thread:$0]  %s2889_s5, 4096, %s60_s17, [#allocation9], %s2729_s3, %s2729_s3, %s2730_s11  }
  0x45   :  { %2715 = dma.done.wait [#allocation3], 32  }
  0x46   :  { %2716 = vsyncadd [#allocation3], 4294967264 }
  0x47   :  { %2717 = dma.done.wait [#allocation6], 24576  }
  0x48   :  { %2718 = vsyncadd [#allocation6], 4294942720 }
  0x49   :  { %2719 = dma.done.wait [#allocation9], 4096  }
  0x4a   :  { %2720 = vsyncadd [#allocation9], 4294963200  ;;  %v2253_v0 = vld [vmem:[#allocation5 + $0x4] ss:$16 sps:$4 sm:$0xff]   ;;  %v2255_v1 = vld [vmem:[#allocation5] ss:$16 sps:$4 sm:$0xff]   ;;  %v83_v18 = vlaneseq }
  0x4b   :  { %501 = vmatprep.subr.bf16.mxu0 %v2253_v0  ;;  %v2256_v2 = vld [vmem:[#allocation5 + $0x24] ss:$16 sps:$4 sm:$0xff]   ;;  %v2258_v3 = vld [vmem:[#allocation5 + $0x20] ss:$16 sps:$4 sm:$0xff]   ;;  %v2282_v9 = vld [vmem:[#allocation5 + $0xc] ss:$16 sps:$4 sm:$0xff]  }
  0x4c   :  { %502 = vmatpush1.bf16.msra.mxu0 %v2255_v1  ;;  %v2259_v4 = vld [vmem:[#allocation5 + $0x44] ss:$16 sps:$4 sm:$0xff]   ;;  %v2261_v5 = vld [vmem:[#allocation5 + $0x40] ss:$16 sps:$4 sm:$0xff]   ;;  %v2285_v10 = vld [vmem:[#allocation5 + $0x8] ss:$16 sps:$4 sm:$0xff]   ;;  %542 = vmatprep.subr.bf16.mxu1 %v2282_v9 }
  0x4d   :  { %503 = vmatprep.subr.bf16.mxu0 %v2256_v2  ;;  %v2262_v6 = vld [vmem:[#allocation5 + $0x64] ss:$16 sps:$4 sm:$0xff]   ;;  %v2264_v7 = vld [vmem:[#allocation5 + $0x60] ss:$16 sps:$4 sm:$0xff]   ;;  %543 = vmatpush1.bf16.msra.mxu1 %v2285_v10  ;;  %v2288_v13 = vld [vmem:[#allocation5 + $0x2c] ss:$16 sps:$4 sm:$0xff]  }
  0x4e   :  { %v2265_v8 = vld [vmem:[#allocation5 + $0x84] ss:$16 sps:$4 sm:$0xff]   ;;  %v2267_v11 = vld [vmem:[#allocation5 + $0x80] ss:$16 sps:$4 sm:$0xff]   ;;  %v2291_v14 = vld [vmem:[#allocation5 + $0x28] ss:$16 sps:$4 sm:$0xff]   ;;  %544 = vmatprep.subr.bf16.mxu1 %v2288_v13 }
  0x4f   :  { %v2268_v12 = vld [vmem:[#allocation5 + $0xa4] ss:$16 sps:$4 sm:$0xff]   ;;  %v2270_v15 = vld [vmem:[#allocation5 + $0xa0] ss:$16 sps:$4 sm:$0xff]   ;;  %v2294_v17 = vld [vmem:[#allocation5 + $0x4c] ss:$16 sps:$4 sm:$0xff]  }
  0x50   :  { %504 = vmatpush1.bf16.msra.mxu0 %v2258_v3  ;;  %v2271_v16 = vld [vmem:[#allocation5 + $0xc4] ss:$16 sps:$4 sm:$0xff]   ;;  %v2297_v19 = vld [vmem:[#allocation5 + $0x48] ss:$16 sps:$4 sm:$0xff]   ;;  %v2300_v20 = vld [vmem:[#allocation5 + $0x6c] ss:$16 sps:$4 sm:$0xff]  }
  0x51   :  { %505 = vmatprep.subr.bf16.mxu0 %v2259_v4  ;;  %545 = vmatpush1.bf16.msra.mxu1 %v2291_v14  ;;  %v2273_v21 = vld [vmem:[#allocation5 + $0xc0] ss:$16 sps:$4 sm:$0xff]   ;;  %v2826_v22 = vshrl.u32 %v83_v18, 7  ;;  %v2274_v23 = vld [vmem:[#allocation5 + $0xe4] ss:$16 sps:$4 sm:$0xff]   ;;  %s2731_s29 = smov [#allocation10]  }
  0x52   :  { %546 = vmatprep.subr.bf16.mxu1 %v2294_v17  ;;  %v2303_v24 = vld [vmem:[#allocation5 + $0x68] ss:$16 sps:$4 sm:$0xff]   ;;  %v2306_v25 = vld [vmem:[#allocation5 + $0x8c] ss:$16 sps:$4 sm:$0xff]   ;;  %v2276_v26 = vld [vmem:[#allocation5 + $0xe0] ss:$16 sps:$4 sm:$0xff]  }
  0x53   :  { %v2277_v27 = vld [vmem:[#allocation5 + $0x104] ss:$16 sps:$4 sm:$0xff]   ;;  %v2829_v28 = vsub.s32 1, %v2826_v22  ;;  %v2309_v29 = vld [vmem:[#allocation5 + $0x88] ss:$16 sps:$4 sm:$0xff]   ;;  %v2833_v59 = vsub.s32 0, %v2826_v22 }
  0x54   :  { %506 = vmatpush1.bf16.msra.mxu0 %v2261_v5  ;;  %v2312_v30 = vld [vmem:[#allocation5 + $0xac] ss:$16 sps:$4 sm:$0xff]   ;;  %v2279_v31 = vld [vmem:[#allocation5 + $0x100] ss:$16 sps:$4 sm:$0xff]   ;;  %v2280_v33 = vld [vmem:[#allocation5 + $0x124] ss:$16 sps:$4 sm:$0xff]  }
  0x55   :  { %507 = vmatprep.subr.bf16.mxu0 %v2262_v6  ;;  %547 = vmatpush1.bf16.msra.mxu1 %v2297_v19  ;;  %v81_v32 = vld [vmem:[#allocation2] sm:$0x3]  ;;  %v2315_v35 = vld [vmem:[#allocation5 + $0xa8] ss:$16 sps:$4 sm:$0xff]   ;;  %v2284_v38 = vld [vmem:[#allocation5 + $0x120] ss:$16 sps:$4 sm:$0xff]  }
  0x56   :  { %548 = vmatprep.subr.bf16.mxu1 %v2300_v20  ;;  %v90_v34 = vrot.slane %v81_v32, %v2829_v28  ;;  %v2318_v36 = vld [vmem:[#allocation5 + $0xcc] ss:$16 sps:$4 sm:$0xff]   ;;  %v2286_v39 = vld [vmem:[#allocation5 + $0x144] ss:$16 sps:$4 sm:$0xff]   ;;  %v2321_v40 = vld [vmem:[#allocation5 + $0xc8] ss:$16 sps:$4 sm:$0xff]   ;;  %v86_v0 = vrot.slane %v81_v32, %v2833_v59 }
  0x57   :  { %v2322_v41 = vld [vmem:[#allocation5 + $0xec] ss:$16 sps:$4 sm:$0xff]   ;;  %v2290_v42 = vld [vmem:[#allocation5 + $0x140] ss:$16 sps:$4 sm:$0xff]   ;;  %v2292_v43 = vld [vmem:[#allocation5 + $0x164] ss:$16 sps:$4 sm:$0xff]  }
  0x58   :  { %508 = vmatpush1.bf16.msra.mxu0 %v2264_v7  ;;  %v94_v37 = vpack.c.bf16 %v90_v34, %v90_v34  ;;  %v2324_v44 = vld [vmem:[#allocation5 + $0xe8] ss:$16 sps:$4 sm:$0xff]   ;;  %v2325_v45 = vld [vmem:[#allocation5 + $0x10c] ss:$16 sps:$4 sm:$0xff]   ;;  %v2296_v46 = vld [vmem:[#allocation5 + $0x160] ss:$16 sps:$4 sm:$0xff]   ;;  %v93_v4 = vpack.c.bf16 %v86_v0, %v86_v0 }
  0x59   :  { %509 = vmatprep.subr.bf16.mxu0 %v2265_v8  ;;  %549 = vmatpush1.bf16.msra.mxu1 %v2303_v24  ;;  %v2298_v47 = vld [vmem:[#allocation5 + $0x184] ss:$16 sps:$4 sm:$0xff]   ;;  %v2327_v48 = vld [vmem:[#allocation5 + $0x108] ss:$16 sps:$4 sm:$0xff]   ;;  %v2328_v49 = vld [vmem:[#allocation5 + $0x12c] ss:$16 sps:$4 sm:$0xff]  }
  0x5a   :  { %550 = vmatprep.subr.bf16.mxu1 %v2306_v25  ;;  %533 = vmatprep.mubr.bf16.mxu0 %v94_v37  ;;  %v2302_v50 = vld [vmem:[#allocation5 + $0x180] ss:$16 sps:$4 sm:$0xff]   ;;  %v2304_v51 = vld [vmem:[#allocation5 + $0x1a4] ss:$16 sps:$4 sm:$0xff]   ;;  %v2330_v52 = vld [vmem:[#allocation5 + $0x128] ss:$16 sps:$4 sm:$0xff]  }
  0x5b   :  { %574 = vmatprep.mubr.bf16.mxu1 %v94_v37  ;;  %v2331_v53 = vld [vmem:[#allocation5 + $0x14c] ss:$16 sps:$4 sm:$0xff]   ;;  %v2308_v54 = vld [vmem:[#allocation5 + $0x1a0] ss:$16 sps:$4 sm:$0xff]   ;;  %v2310_v55 = vld [vmem:[#allocation5 + $0x1c4] ss:$16 sps:$4 sm:$0xff]  }
  0x5c   :  { %510 = vmatpush1.bf16.msra.mxu0 %v2267_v11  ;;  %v2333_v56 = vld [vmem:[#allocation5 + $0x148] ss:$16 sps:$4 sm:$0xff]   ;;  %v2334_v57 = vld [vmem:[#allocation5 + $0x16c] ss:$16 sps:$4 sm:$0xff]   ;;  %v2314_v58 = vld [vmem:[#allocation5 + $0x1c0] ss:$16 sps:$4 sm:$0xff]  }
  0x5d   :  { %511 = vmatprep.subr.bf16.mxu0 %v2268_v12  ;;  %551 = vmatpush1.bf16.msra.mxu1 %v2309_v29  ;;  %v2316_v60 = vld [vmem:[#allocation5 + $0x1e4] ss:$16 sps:$4 sm:$0xff]   ;;  %v2336_v61 = vld [vmem:[#allocation5 + $0x168] ss:$16 sps:$4 sm:$0xff]   ;;  %v2337_v62 = vld [vmem:[#allocation5 + $0x18c] ss:$16 sps:$4 sm:$0xff]  }
  0x5e   :  { %552 = vmatprep.subr.bf16.mxu1 %v2312_v30  ;;  %v2320_v63 = vld [vmem:[#allocation5 + $0x1e0] ss:$16 sps:$4 sm:$0xff]   ;;  %v2339_v1 = vld [vmem:[#allocation5 + $0x188] ss:$16 sps:$4 sm:$0xff]   ;;  %v2351_v2 = vld [vmem:[#allocation7 + $0x4] ss:$16 sps:$4 sm:$0xff]  }
  0x5f   :  { %v2340_v3 = vld [vmem:[#allocation5 + $0x1ac] ss:$16 sps:$4 sm:$0xff]   ;;  %v2342_v5 = vld [vmem:[#allocation5 + $0x1a8] ss:$16 sps:$4 sm:$0xff]   ;;  %v2349_v6 = vld [vmem:[#allocation7] ss:$16 sps:$4 sm:$0xff]  }
  0x60   :  { %512 = vmatpush1.bf16.msra.mxu0 %v2270_v15  ;;  %v2343_v7 = vld [vmem:[#allocation5 + $0x1cc] ss:$16 sps:$4 sm:$0xff]   ;;  %v2357_v8 = vld [vmem:[#allocation7 + $0x24] ss:$16 sps:$4 sm:$0xff]   ;;  %v2355_v9 = vld [vmem:[#allocation7 + $0x20] ss:$16 sps:$4 sm:$0xff]  }
  0x61   :  { %513 = vmatprep.subr.bf16.mxu0 %v2271_v16  ;;  %553 = vmatpush1.bf16.msra.mxu1 %v2315_v35  ;;  %v2345_v10 = vld [vmem:[#allocation5 + $0x1c8] ss:$16 sps:$4 sm:$0xff]   ;;  %v2363_v11 = vld [vmem:[#allocation7 + $0x44] ss:$16 sps:$4 sm:$0xff]   ;;  %v2346_v12 = vld [vmem:[#allocation5 + $0x1ec] ss:$16 sps:$4 sm:$0xff]  }
  0x62   :  { %554 = vmatprep.subr.bf16.mxu1 %v2318_v36  ;;  %v2361_v13 = vld [vmem:[#allocation7 + $0x40] ss:$16 sps:$4 sm:$0xff]   ;;  %v2348_v14 = vld [vmem:[#allocation5 + $0x1e8] ss:$16 sps:$4 sm:$0xff]   ;;  %v2369_v15 = vld [vmem:[#allocation7 + $0x64] ss:$16 sps:$4 sm:$0xff]  }
  0x63   :  { %v2354_v16 = vld [vmem:[#allocation7 + $0xc] ss:$16 sps:$4 sm:$0xff]   ;;  %v2367_v17 = vld [vmem:[#allocation7 + $0x60] ss:$16 sps:$4 sm:$0xff]   ;;  %v2352_v18 = vld [vmem:[#allocation7 + $0x8] ss:$16 sps:$4 sm:$0xff]  }
  0x64   :  { %514 = vmatpush1.bf16.msra.mxu0 %v2273_v21  ;;  %v2375_v19 = vld [vmem:[#allocation7 + $0x84] ss:$16 sps:$4 sm:$0xff]   ;;  %v2360_v20 = vld [vmem:[#allocation7 + $0x2c] ss:$16 sps:$4 sm:$0xff]   ;;  %v2373_v21 = vld [vmem:[#allocation7 + $0x80] ss:$16 sps:$4 sm:$0xff]  }
  0x65   :  { %515 = vmatprep.subr.bf16.mxu0 %v2274_v23  ;;  %555 = vmatpush1.bf16.msra.mxu1 %v2321_v40  ;;  %v2358_v23 = vld [vmem:[#allocation7 + $0x28] ss:$16 sps:$4 sm:$0xff]   ;;  %v2381_v24 = vld [vmem:[#allocation7 + $0xa4] ss:$16 sps:$4 sm:$0xff]   ;;  %v2366_v25 = vld [vmem:[#allocation7 + $0x4c] ss:$16 sps:$4 sm:$0xff]  }
  0x66   :  { %556 = vmatprep.subr.bf16.mxu1 %v2322_v41  ;;  %v2387_v29 = vld [vmem:[#allocation7 + $0xc4] ss:$16 sps:$4 sm:$0xff]   ;;  %v2372_v30 = vld [vmem:[#allocation7 + $0x6c] ss:$16 sps:$4 sm:$0xff]   ;;  %v2370_v32 = vld [vmem:[#allocation7 + $0x68] ss:$16 sps:$4 sm:$0xff]  }
  0x67   :  { %v2378_v34 = vld [vmem:[#allocation7 + $0x8c] ss:$16 sps:$4 sm:$0xff]   ;;  %v2391_v35 = vld [vmem:[#allocation7 + $0xe0] ss:$16 sps:$4 sm:$0xff]   ;;  %v2376_v36 = vld [vmem:[#allocation7 + $0x88] ss:$16 sps:$4 sm:$0xff]  }
  0x68   :  { %516 = vmatpush1.bf16.msra.mxu0 %v2276_v26  ;;  %v2379_v26 = vld [vmem:[#allocation7 + $0xa0] ss:$16 sps:$4 sm:$0xff]   ;;  %v2384_v37 = vld [vmem:[#allocation7 + $0xac] ss:$16 sps:$4 sm:$0xff]   ;;  %v2388_v40 = vld [vmem:[#allocation7 + $0xc8] ss:$16 sps:$4 sm:$0xff]  }
  0x69   :  { %517 = vmatprep.subr.bf16.mxu0 %v2277_v27  ;;  %557 = vmatpush1.bf16.msra.mxu1 %v2324_v44  ;;  %v2364_v27 = vld [vmem:[#allocation7 + $0x48] ss:$16 sps:$4 sm:$0xff]   ;;  %v2396_v41 = vld [vmem:[#allocation7 + $0xec] ss:$16 sps:$4 sm:$0xff]   ;;  %v2429_v0 = vld [vmem:[#allocation7 + $0x1a4] ss:$16 sps:$4 sm:$0xff]  }
  0x6a   :  { %558 = vmatprep.subr.bf16.mxu1 %v2325_v45  ;;  %v2402_v44 = vld [vmem:[#allocation7 + $0x10c] ss:$16 sps:$4 sm:$0xff]   ;;  %v2397_v45 = vld [vmem:[#allocation7 + $0x100] ss:$16 sps:$4 sm:$0xff]   ;;  %s1945_s30 = sshll.u32 %s2731_s29, 4  ;;  %s1946_s30 = int_to_ptr.vmem [resolvable:$true] %s1945_s30 }
  0x6b   :  { %s2693_s8 = scalar_lea.vmem %s1946_s30, 16  ;;  %s2697_s9 = scalar_lea.vmem %s1946_s30, 32 }
  0x6c   :  { %518 = vmatpush1.bf16.msra.mxu0 %v2279_v31  ;;  %v2385_v31 = vld [vmem:[#allocation7 + $0xc0] ss:$16 sps:$4 sm:$0xff]   ;;  %p2694_p4 = scmp.ne.s32.totalorder %s1946_s30, %s2693_s8  ;;  %p2698_p5 = scmp.lt.s32.totalorder %s1946_s30, %s1946_s30 }
  0x6d   :  { %519 = vmatprep.subr.bf16.mxu0 %v2280_v33  ;;  %559 = vmatpush1.bf16.msra.mxu1 %v2327_v48  ;;  %v2393_v33 = vld [vmem:[#allocation7 + $0xe4] ss:$16 sps:$4 sm:$0xff]   ;;  %v2408_v48 = vld [vmem:[#allocation7 + $0x12c] ss:$16 sps:$4 sm:$0xff]   ;;  %p2699_p6 = scmp.lt.s32.totalorder %s2697_s9, %s2693_s8 }
  0x6e   :  { %560 = vmatprep.subr.bf16.mxu1 %v2328_v49  ;;  %v2403_v49 = vld [vmem:[#allocation7 + $0x120] ss:$16 sps:$4 sm:$0xff]  }
  0x6f   :  { %p2700_p7 = por %p2699_p6, %p2698_p5 }
  0x70   :  { %520 = vmatpush1.bf16.msra.mxu0 %v2284_v38  ;;  %v2382_v38 = vld [vmem:[#allocation7 + $0xa8] ss:$16 sps:$4 sm:$0xff]  }
  0x71   :  { %521 = vmatprep.subr.bf16.mxu0 %v2286_v39  ;;  %561 = vmatpush1.bf16.msra.mxu1 %v2330_v52  ;;  %v2390_v39 = vld [vmem:[#allocation7 + $0xcc] ss:$16 sps:$4 sm:$0xff]   ;;  %p2701_p8 = pnand %p2700_p7, %p2694_p4 }
  0x72   :  { %562 = vmatprep.subr.bf16.mxu1 %v2331_v53  ;;  %v2414_v52 = vld [vmem:[#allocation7 + $0x14c] ss:$16 sps:$4 sm:$0xff]   ;;  %v2409_v53 = vld [vmem:[#allocation7 + $0x140] ss:$16 sps:$4 sm:$0xff]  }
  0x74   :  { %522 = vmatpush1.bf16.msra.mxu0 %v2290_v42  ;;  %v2394_v42 = vld [vmem:[#allocation7 + $0xe8] ss:$16 sps:$4 sm:$0xff]  }
  0x75   :  { %523 = vmatprep.subr.bf16.mxu0 %v2292_v43  ;;  %563 = vmatpush1.bf16.msra.mxu1 %v2333_v56  ;;  %v2399_v43 = vld [vmem:[#allocation7 + $0x104] ss:$16 sps:$4 sm:$0xff]   ;;  %v2420_v56 = vld [vmem:[#allocation7 + $0x16c] ss:$16 sps:$4 sm:$0xff]  }
  0x76   :  { %564 = vmatprep.subr.bf16.mxu1 %v2334_v57  ;;  %v2415_v57 = vld [vmem:[#allocation7 + $0x160] ss:$16 sps:$4 sm:$0xff]  }
  0x78   :  { %524 = vmatpush1.bf16.msra.mxu0 %v2296_v46  ;;  %v2400_v46 = vld [vmem:[#allocation7 + $0x108] ss:$16 sps:$4 sm:$0xff]  }
  0x79   :  { %525 = vmatprep.subr.bf16.mxu0 %v2298_v47  ;;  %565 = vmatpush1.bf16.msra.mxu1 %v2336_v61  ;;  %v2405_v47 = vld [vmem:[#allocation7 + $0x124] ss:$16 sps:$4 sm:$0xff]   ;;  %v2426_v61 = vld [vmem:[#allocation7 + $0x18c] ss:$16 sps:$4 sm:$0xff]  }
  0x7a   :  { %566 = vmatprep.subr.bf16.mxu1 %v2337_v62  ;;  %v2421_v62 = vld [vmem:[#allocation7 + $0x180] ss:$16 sps:$4 sm:$0xff]  }
  0x7c   :  { %526 = vmatpush1.bf16.msra.mxu0 %v2302_v50  ;;  %v2406_v50 = vld [vmem:[#allocation7 + $0x128] ss:$16 sps:$4 sm:$0xff]  }
  0x7d   :  { %527 = vmatprep.subr.bf16.mxu0 %v2304_v51  ;;  %567 = vmatpush1.bf16.msra.mxu1 %v2339_v1  ;;  %v2411_v51 = vld [vmem:[#allocation7 + $0x144] ss:$16 sps:$4 sm:$0xff]   ;;  %v2432_v1 = vld [vmem:[#allocation7 + $0x1ac] ss:$16 sps:$4 sm:$0xff]  }
  0x7e   :  { %568 = vmatprep.subr.bf16.mxu1 %v2340_v3  ;;  %v2430_v3 = vld [vmem:[#allocation7 + $0x1a8] ss:$16 sps:$4 sm:$0xff]  }
  0x80   :  { %528 = vmatpush1.bf16.msra.mxu0 %v2308_v54  ;;  %v2412_v54 = vld [vmem:[#allocation7 + $0x148] ss:$16 sps:$4 sm:$0xff]  }
  0x81   :  { %529 = vmatprep.subr.bf16.mxu0 %v2310_v55  ;;  %569 = vmatpush1.bf16.msra.mxu1 %v2342_v5  ;;  %v2417_v55 = vld [vmem:[#allocation7 + $0x164] ss:$16 sps:$4 sm:$0xff]   ;;  %v2438_v5 = vld [vmem:[#allocation7 + $0x1cc] ss:$16 sps:$4 sm:$0xff]  }
  0x82   :  { %570 = vmatprep.subr.bf16.mxu1 %v2343_v7  ;;  %v2436_v7 = vld [vmem:[#allocation7 + $0x1c8] ss:$16 sps:$4 sm:$0xff]  }
  0x84   :  { %530 = vmatpush1.bf16.msra.mxu0 %v2314_v58  ;;  %v2418_v58 = vld [vmem:[#allocation7 + $0x168] ss:$16 sps:$4 sm:$0xff]  }
  0x85   :  { %531 = vmatprep.subr.bf16.mxu0 %v2316_v60  ;;  %571 = vmatpush1.bf16.msra.mxu1 %v2345_v10  ;;  %v2423_v60 = vld [vmem:[#allocation7 + $0x184] ss:$16 sps:$4 sm:$0xff]   ;;  %v2439_v10 = vld [vmem:[#allocation7 + $0x1e0] ss:$16 sps:$4 sm:$0xff]  }
  0x86   :  { %572 = vmatprep.subr.bf16.mxu1 %v2346_v12  ;;  %v2447_v12 = vld [vmem:[#allocation7 + $0x204] ss:$16 sps:$4 sm:$0xff]  }
  0x88   :  { %532 = vmatpush1.bf16.msra.mxu0 %v2320_v63  ;;  %v2424_v63 = vld [vmem:[#allocation7 + $0x188] ss:$16 sps:$4 sm:$0xff]  }
  0x89   :  { %1405 = vmatprep.subr.bf16.mxu0 %v2351_v2  ;;  %573 = vmatpush1.bf16.msra.mxu1 %v2348_v14  ;;  %v2427_v2 = vld [vmem:[#allocation7 + $0x1a0] ss:$16 sps:$4 sm:$0xff]  }
  0x8a   :  { %1487 = vmatprep.subr.bf16.mxu1 %v2354_v16  ;;  %v2839_v14 = vld [vmem:[%s2886_s2] sm:$0xf] }
  0x8b   :  { %534 = vmatmul.mubr.bf16.vlgmr.msra.gmra.mrb[0].mxu0 %v93_v4  ;;  %v488_v16 = vrot.slane %v2839_v14, %v2829_v28 }
  0x8c   :  { %1406 = vmatpush1.bf16.msra.mxu0 %v2349_v6  ;;  %575 = vmatmul.mubr.bf16.vlgmr.msra.gmra.mrb[0].mxu1 %v93_v4  ;;  %v2435_v4 = vld [vmem:[#allocation7 + $0x1c4] ss:$16 sps:$4 sm:$0xff]   ;;  %v2433_v6 = vld [vmem:[#allocation7 + $0x1c0] ss:$16 sps:$4 sm:$0xff]  }
  0x8d   :  { %1407 = vmatprep.subr.bf16.mxu0 %v2357_v8  ;;  %1488 = vmatpush1.bf16.msra.mxu1 %v2352_v18  ;;  %v2441_v8 = vld [vmem:[#allocation7 + $0x1e4] ss:$16 sps:$4 sm:$0xff]  }
  0x8e   :  { %1489 = vmatprep.subr.bf16.mxu1 %v2360_v20 }
  0x90   :  { %1408 = vmatpush1.bf16.msra.mxu0 %v2355_v9  ;;  %v2444_v9 = vld [vmem:[#allocation7 + $0x1ec] ss:$16 sps:$4 sm:$0xff]  }
  0x91   :  { %1409 = vmatprep.subr.bf16.mxu0 %v2363_v11  ;;  %1490 = vmatpush1.bf16.msra.mxu1 %v2358_v23  ;;  %v2442_v11 = vld [vmem:[#allocation7 + $0x1e8] ss:$16 sps:$4 sm:$0xff]  }
  0x92   :  { %1491 = vmatprep.subr.bf16.mxu1 %v2366_v25 }
  0x94   :  { %1410 = vmatpush1.bf16.msra.mxu0 %v2361_v13  ;;  %v2450_v13 = vld [vmem:[#allocation7 + $0x20c] ss:$16 sps:$4 sm:$0xff]  }
  0x95   :  { %1411 = vmatprep.subr.bf16.mxu0 %v2369_v15  ;;  %1492 = vmatpush1.bf16.msra.mxu1 %v2364_v27  ;;  %v484_v15 = vrot.slane %v2839_v14, %v2833_v59 }
  0x96   :  { %1493 = vmatprep.subr.bf16.mxu1 %v2372_v30 }
  0x98   :  { %1412 = vmatpush1.bf16.msra.mxu0 %v2367_v17 }
  0x99   :  { %1413 = vmatprep.subr.bf16.mxu0 %v2375_v19  ;;  %1494 = vmatpush1.bf16.msra.mxu1 %v2370_v32 }
  0x9a   :  { %1495 = vmatprep.subr.bf16.mxu1 %v2378_v34 }
  0x9c   :  { %1414 = vmatpush1.bf16.msra.mxu0 %v2373_v21 }
  0x9d   :  { %1415 = vmatprep.subr.bf16.mxu0 %v2381_v24  ;;  %1496 = vmatpush1.bf16.msra.mxu1 %v2376_v36 }
  0x9e   :  { %1497 = vmatprep.subr.bf16.mxu1 %v2384_v37 }
  0xa0   :  { %1416 = vmatpush1.bf16.msra.mxu0 %v2379_v26  ;;  %v495_v26 = vsub.s32 3, %v2826_v22 }
  0xa1   :  { %1417 = vmatprep.subr.bf16.mxu0 %v2387_v29  ;;  %1498 = vmatpush1.bf16.msra.mxu1 %v2382_v38 }
  0xa2   :  { %1499 = vmatprep.subr.bf16.mxu1 %v2390_v39  ;;  %v496_v27 = vrot.slane %v2839_v14, %v495_v26 }
  0xa4   :  { %1418 = vmatpush1.bf16.msra.mxu0 %v2385_v31 }
  0xa5   :  { %1419 = vmatprep.subr.bf16.mxu0 %v2393_v33  ;;  %1500 = vmatpush1.bf16.msra.mxu1 %v2388_v40 }
  0xa6   :  { %1501 = vmatprep.subr.bf16.mxu1 %v2396_v41 }
  0xa8   :  { %1420 = vmatpush1.bf16.msra.mxu0 %v2391_v35 }
  0xa9   :  { %1502 = vmatpush1.bf16.msra.mxu1 %v2394_v42  ;;  %1421 = vmatprep.subr.bf16.mxu0 %v2399_v43 }
  0xaa   :  { %1503 = vmatprep.subr.bf16.mxu1 %v2402_v44 }
  0xac   :  { %1422 = vmatpush1.bf16.msra.mxu0 %v2397_v45  ;;  %v2445_v45 = vld [vmem:[#allocation7 + $0x200] ss:$16 sps:$4 sm:$0xff]  }
  0xad   :  { %1504 = vmatpush1.bf16.msra.mxu1 %v2400_v46  ;;  %1423 = vmatprep.subr.bf16.mxu0 %v2405_v47  ;;  %v2448_v46 = vld [vmem:[#allocation7 + $0x208] ss:$16 sps:$4 sm:$0xff]  }
  0xae   :  { %1505 = vmatprep.subr.bf16.mxu1 %v2408_v48 }
  0xb0   :  { %1424 = vmatpush1.bf16.msra.mxu0 %v2403_v49  ;;  %v2453_v49 = vld [vmem:[#allocation7 + $0x224] ss:$16 sps:$4 sm:$0xff]  }
  0xb1   :  { %1506 = vmatpush1.bf16.msra.mxu1 %v2406_v50  ;;  %1425 = vmatprep.subr.bf16.mxu0 %v2411_v51  ;;  %v2456_v50 = vld [vmem:[#allocation7 + $0x22c] ss:$16 sps:$4 sm:$0xff]   ;;  %v2451_v51 = vld [vmem:[#allocation7 + $0x220] ss:$16 sps:$4 sm:$0xff]  }
  0xb2   :  { %1507 = vmatprep.subr.bf16.mxu1 %v2414_v52  ;;  %v2454_v52 = vld [vmem:[#allocation7 + $0x228] ss:$16 sps:$4 sm:$0xff]  }
  0xb4   :  { %1426 = vmatpush1.bf16.msra.mxu0 %v2409_v53  ;;  %v2459_v53 = vld [vmem:[#allocation7 + $0x244] ss:$16 sps:$4 sm:$0xff]  }
  0xb5   :  { %1508 = vmatpush1.bf16.msra.mxu1 %v2412_v54  ;;  %1427 = vmatprep.subr.bf16.mxu0 %v2417_v55  ;;  %v2462_v54 = vld [vmem:[#allocation7 + $0x24c] ss:$16 sps:$4 sm:$0xff]   ;;  %v2457_v55 = vld [vmem:[#allocation7 + $0x240] ss:$16 sps:$4 sm:$0xff]  }
  0xb6   :  { %1509 = vmatprep.subr.bf16.mxu1 %v2420_v56  ;;  %v2460_v56 = vld [vmem:[#allocation7 + $0x248] ss:$16 sps:$4 sm:$0xff]  }
  0xb8   :  { %1428 = vmatpush1.bf16.msra.mxu0 %v2415_v57  ;;  %v2465_v57 = vld [vmem:[#allocation7 + $0x264] ss:$16 sps:$4 sm:$0xff]  }
  0xb9   :  { %1510 = vmatpush1.bf16.msra.mxu1 %v2418_v58  ;;  %1429 = vmatprep.subr.bf16.mxu0 %v2423_v60  ;;  %v2468_v58 = vld [vmem:[#allocation7 + $0x26c] ss:$16 sps:$4 sm:$0xff]  }
  0xba   :  { %1511 = vmatprep.subr.bf16.mxu1 %v2426_v61  ;;  %v2463_v61 = vld [vmem:[#allocation7 + $0x260] ss:$16 sps:$4 sm:$0xff]  }
  0xbc   :  { %1430 = vmatpush1.bf16.msra.mxu0 %v2421_v62  ;;  %v2466_v62 = vld [vmem:[#allocation7 + $0x268] ss:$16 sps:$4 sm:$0xff]  }
  0xbd   :  { %1512 = vmatpush1.bf16.msra.mxu1 %v2424_v63  ;;  %1431 = vmatprep.subr.bf16.mxu0 %v2429_v0  ;;  %v2471_v0 = vld [vmem:[#allocation7 + $0x284] ss:$16 sps:$4 sm:$0xff]  }
  0xbe   :  { %1513 = vmatprep.subr.bf16.mxu1 %v2432_v1  ;;  %v2474_v1 = vld [vmem:[#allocation7 + $0x28c] ss:$16 sps:$4 sm:$0xff]  }
  0xc0   :  { %1432 = vmatpush1.bf16.msra.mxu0 %v2427_v2  ;;  %v491_v2 = vsub.s32 2, %v2826_v22 }
  0xc1   :  { %1514 = vmatpush1.bf16.msra.mxu1 %v2430_v3  ;;  %1433 = vmatprep.subr.bf16.mxu0 %v2435_v4  ;;  %v2469_v4 = vld [vmem:[#allocation7 + $0x280] ss:$16 sps:$4 sm:$0xff]  }
  0xc2   :  { %1515 = vmatprep.subr.bf16.mxu1 %v2438_v5  ;;  %v2472_v5 = vld [vmem:[#allocation7 + $0x288] ss:$16 sps:$4 sm:$0xff]  }
  0xc4   :  { %1434 = vmatpush1.bf16.msra.mxu0 %v2433_v6  ;;  %v2477_v6 = vld [vmem:[#allocation7 + $0x2a4] ss:$16 sps:$4 sm:$0xff]  }
  0xc5   :  { %1516 = vmatpush1.bf16.msra.mxu1 %v2436_v7  ;;  %1435 = vmatprep.subr.bf16.mxu0 %v2441_v8  ;;  %v2480_v7 = vld [vmem:[#allocation7 + $0x2ac] ss:$16 sps:$4 sm:$0xff]   ;;  %v492_v8 = vrot.slane %v2839_v14, %v491_v2 }
  0xc6   :  { %1517 = vmatprep.subr.bf16.mxu1 %v2444_v9  ;;  %v2475_v9 = vld [vmem:[#allocation7 + $0x2a0] ss:$16 sps:$4 sm:$0xff]  }
  0xc8   :  { %1436 = vmatpush1.bf16.msra.mxu0 %v2439_v10  ;;  %v2478_v10 = vld [vmem:[#allocation7 + $0x2a8] ss:$16 sps:$4 sm:$0xff]  }
  0xc9   :  { %1518 = vmatpush1.bf16.msra.mxu1 %v2442_v11  ;;  %1446 = vmatprep.subr.bf16.mxu0 %v2447_v12  ;;  %v2483_v11 = vld [vmem:[#allocation7 + $0x2c4] ss:$16 sps:$4 sm:$0xff]   ;;  %v2486_v12 = vld [vmem:[#allocation7 + $0x2cc] ss:$16 sps:$4 sm:$0xff]  }
  0xca   :  { %1528 = vmatprep.subr.bf16.mxu1 %v2450_v13 }
 0x15e   :  { %v535_v17 = vpop.f32.mrb[0].mxu0 }
 0x15f   :  { %v536_v18 = vadd.f32 %v535_v17, %v484_v15  ;;  %v537_v19 = vpop.f32.mrb[1].mxu0  ;;  %v2849_v29 = vpop.f32.mrb[0].mxu1  ;;  %v2481_v15 = vld [vmem:[#allocation7 + $0x2c0] ss:$16 sps:$4 sm:$0xff]   ;;  %v2489_v17 = vld [vmem:[#allocation7 + $0x2e4] ss:$16 sps:$4 sm:$0xff]  }
 0x160   :  { %v538_v20 = vadd.f32 %v537_v19, %v488_v16  ;;  %v539_v21 = vpop.f32.mrb[2].mxu0  ;;  %v578_v30 = vpop.f32.mrb[1].mxu1  ;;  %v2856_v13 = vadd.f32 %v2849_v29, %v492_v8  ;;  %v2484_v16 = vld [vmem:[#allocation7 + $0x2c8] ss:$16 sps:$4 sm:$0xff]   ;;  %v2487_v19 = vld [vmem:[#allocation7 + $0x2e0] ss:$16 sps:$4 sm:$0xff]  }
 0x161   :  { %v2020_v23 = vmul.f32 -1.442695, %v536_v18  ;;  %v540_v24 = vpop.f32.mrb[3].mxu0  ;;  %v579_v32 = vadd.f32 %v578_v30, %v496_v27  ;;  %v580_v33 = vpop.f32.mrb[2].mxu1  ;;  %v2495_v21 = vld [vmem:[#allocation7 + $0x304] ss:$16 sps:$4 sm:$0xff]  }
 0x162   :  { %v2021_v25 = vmul.f32 -1.442695, %v538_v20  ;;  %v581_v36 = vpop.f32.mrb[3].mxu1  ;;  %v2022_v14 = vmul.f32 -1.442695, %v2856_v13  ;;  %v2550_v8 = vld [vmem:[#allocation8 + $0xd0] sm:$0xff]  }
 0x163   :  { %2573 = vpow2.f32 %v2020_v23  ;;  %v2023_v38 = vmul.f32 -1.442695, %v579_v32  ;;  %v2498_v23 = vld [vmem:[#allocation7 + $0x30c] ss:$16 sps:$4 sm:$0xff]   ;;  %v2493_v24 = vld [vmem:[#allocation7 + $0x300] ss:$16 sps:$4 sm:$0xff]  }
 0x164   :  { %2575 = vpow2.f32 %v2021_v25  ;;  %v2496_v25 = vld [vmem:[#allocation7 + $0x308] ss:$16 sps:$4 sm:$0xff]   ;;  %v2501_v27 = vld [vmem:[#allocation7 + $0x324] ss:$16 sps:$4 sm:$0xff]   ;;  %v2504_v29 = vld [vmem:[#allocation7 + $0x32c] ss:$16 sps:$4 sm:$0xff]  }
 0x165   :  { %v2499_v30 = vld [vmem:[#allocation7 + $0x320] ss:$16 sps:$4 sm:$0xff]   ;;  %v2510_v33 = vld [vmem:[#allocation7 + $0x34c] ss:$16 sps:$4 sm:$0xff]  }
 0x16d   :  { %v2574_v31 = vpop.eup %2573 }
 0x16e   :  { %v2576_v34 = vpop.eup %2575  ;;  %v595_v35 = vadd.f32 1.0, %v2574_v31  ;;  %v2502_v31 = vld [vmem:[#allocation7 + $0x328] ss:$16 sps:$4 sm:$0xff]  }
 0x16f   :  { %v596_v37 = vadd.f32 1.0, %v2576_v34  ;;  %v2505_v34 = vld [vmem:[#allocation7 + $0x340] ss:$16 sps:$4 sm:$0xff]  }
 0x170   :  { %2577 = vrcp.f32 %v595_v35  ;;  %v2508_v35 = vld [vmem:[#allocation7 + $0x348] ss:$16 sps:$4 sm:$0xff]  }
 0x171   :  { %2579 = vrcp.f32 %v596_v37  ;;  %v2513_v37 = vld [vmem:[#allocation7 + $0x364] ss:$16 sps:$4 sm:$0xff]  }
 0x172   :  { %2581 = vpow2.f32 %v2023_v38  ;;  %v2516_v38 = vld [vmem:[#allocation7 + $0x36c] ss:$16 sps:$4 sm:$0xff]  }
 0x17a   :  { %v2578_v39 = vpop.eup %2577 }
 0x17b   :  { %v2580_v40 = vpop.eup %2579  ;;  %v607_v41 = vmul.f32 %v2578_v39, %v536_v18  ;;  %v2492_v18 = vld [vmem:[#allocation7 + $0x2ec] ss:$16 sps:$4 sm:$0xff]  }
 0x17c   :  { %v608_v42 = vmul.f32 %v2580_v40, %v538_v20  ;;  %v2582_v43 = vpop.eup %2581  ;;  %v2490_v20 = vld [vmem:[#allocation7 + $0x2e8] ss:$16 sps:$4 sm:$0xff]   ;;  %v2511_v40 = vld [vmem:[#allocation7 + $0x360] ss:$16 sps:$4 sm:$0xff]  }
 0x17d   :  { %v598_v47 = vadd.f32 1.0, %v2582_v43  ;;  %v611_v48 = vpack.c.bf16 %v607_v41, %v607_v41  ;;  %v2514_v41 = vld [vmem:[#allocation7 + $0x368] ss:$16 sps:$4 sm:$0xff]   ;;  %v2522_v43 = vld [vmem:[#allocation7 + $0x38c] ss:$16 sps:$4 sm:$0xff]  }
 0x17e   :  { %v612_v44 = vpack.c.bf16 %v608_v42, %v608_v42  ;;  %v2519_v42 = vld [vmem:[#allocation7 + $0x384] ss:$16 sps:$4 sm:$0xff]  }
 0x17f   :  { %2583 = vrcp.f32 %v598_v47  ;;  %v2528_v47 = vld [vmem:[#allocation7 + $0x3ac] ss:$16 sps:$4 sm:$0xff]  }
 0x180   :  { %1437 = vmatprep.mubr.bf16.mxu0 %v612_v44  ;;  %1519 = vmatprep.mubr.bf16.mxu1 %v612_v44  ;;  %2585 = vpow2.f32 %v2022_v14  ;;  %v2517_v44 = vld [vmem:[#allocation7 + $0x380] ss:$16 sps:$4 sm:$0xff]  }
 0x181   :  { %1438 = vmatmul.mubr.bf16.vlgmr.msra.gmra.mrb[4].mxu0 %v611_v48  ;;  %1520 = vmatmul.mubr.bf16.vlgmr.msra.gmra.mrb[4].mxu1 %v611_v48  ;;  %v2523_v48 = vld [vmem:[#allocation7 + $0x3a0] ss:$16 sps:$4 sm:$0xff]  }
 0x182   :  { %1447 = vmatpush1.bf16.msra.mxu0 %v2445_v45  ;;  %1529 = vmatpush1.bf16.msra.mxu1 %v2448_v46  ;;  %v2520_v45 = vld [vmem:[#allocation7 + $0x388] ss:$16 sps:$4 sm:$0xff]   ;;  %v2525_v46 = vld [vmem:[#allocation7 + $0x3a4] ss:$16 sps:$4 sm:$0xff]  }
 0x183   :  { %1448 = vmatprep.subr.bf16.mxu0 %v2453_v49  ;;  %1530 = vmatprep.subr.bf16.mxu1 %v2456_v50  ;;  %v2526_v49 = vld [vmem:[#allocation7 + $0x3a8] ss:$16 sps:$4 sm:$0xff]   ;;  %v2531_v50 = vld [vmem:[#allocation7 + $0x3c4] ss:$16 sps:$4 sm:$0xff]  }
 0x184   :  { %v2560_v14 = vld [vmem:[#allocation8 + $0xa0] sm:$0xff]  }
 0x186   :  { %1449 = vmatpush1.bf16.msra.mxu0 %v2451_v51  ;;  %1531 = vmatpush1.bf16.msra.mxu1 %v2454_v52  ;;  %v2534_v51 = vld [vmem:[#allocation7 + $0x3cc] ss:$16 sps:$4 sm:$0xff]   ;;  %v2529_v52 = vld [vmem:[#allocation7 + $0x3c0] ss:$16 sps:$4 sm:$0xff]  }
 0x187   :  { %1450 = vmatprep.subr.bf16.mxu0 %v2459_v53  ;;  %1532 = vmatprep.subr.bf16.mxu1 %v2462_v54  ;;  %v2532_v53 = vld [vmem:[#allocation7 + $0x3c8] ss:$16 sps:$4 sm:$0xff]   ;;  %v2537_v54 = vld [vmem:[#allocation7 + $0x3e4] ss:$16 sps:$4 sm:$0xff]  }
 0x189   :  { %v2584_v60 = vpop.eup %2583 }
 0x18a   :  { %1451 = vmatpush1.bf16.msra.mxu0 %v2457_v55  ;;  %1533 = vmatpush1.bf16.msra.mxu1 %v2460_v56  ;;  %v610_v63 = vmul.f32 %v2584_v60, %v579_v32  ;;  %v2507_v32 = vld [vmem:[#allocation7 + $0x344] ss:$16 sps:$4 sm:$0xff]   ;;  %v2586_v36 = vpop.eup %2585  ;;  %v2540_v55 = vld [vmem:[#allocation7 + $0x3ec] ss:$16 sps:$4 sm:$0xff]  }
 0x18b   :  { %1452 = vmatprep.subr.bf16.mxu0 %v2465_v57  ;;  %1534 = vmatprep.subr.bf16.mxu1 %v2468_v58  ;;  %v597_v39 = vadd.f32 1.0, %v2586_v36  ;;  %v2535_v57 = vld [vmem:[#allocation7 + $0x3e0] ss:$16 sps:$4 sm:$0xff]   ;;  %v2538_v58 = vld [vmem:[#allocation7 + $0x3e8] ss:$16 sps:$4 sm:$0xff]  }
 0x18c   :  { %v614_v3 = vpack.c.bf16 %v610_v63, %v610_v63  ;;  %v2542_v63 = vld [vmem:[#allocation8 + $0xc0] sm:$0xff]  }
 0x18d   :  { %2587 = vrcp.f32 %v597_v39 }
 0x18e   :  { %1453 = vmatpush1.bf16.msra.mxu0 %v2463_v61  ;;  %1535 = vmatpush1.bf16.msra.mxu1 %v2466_v62  ;;  %v2541_v62 = vld [vmem:[#allocation8 + $0x40] sm:$0xff]  }
 0x18f   :  { %1454 = vmatprep.subr.bf16.mxu0 %v2471_v0  ;;  %1536 = vmatprep.subr.bf16.mxu1 %v2474_v1  ;;  %v2543_v0 = vld [vmem:[#allocation8] sm:$0xff]  }
 0x190   :  { %1478 = vmatprep.mubr.bf16.mxu0 %v614_v3  ;;  %1560 = vmatprep.mubr.bf16.mxu1 %v614_v3  ;;  %v2544_v1 = vld [vmem:[#allocation8 + $0x80] sm:$0xff]   ;;  %v2545_v3 = vld [vmem:[#allocation8 + $0x48] sm:$0xff]  }
 0x192   :  { %1455 = vmatpush1.bf16.msra.mxu0 %v2469_v4  ;;  %1537 = vmatpush1.bf16.msra.mxu1 %v2472_v5  ;;  %v2546_v4 = vld [vmem:[#allocation8 + $0xc8] sm:$0xff]  }
 0x193   :  { %1456 = vmatprep.subr.bf16.mxu0 %v2477_v6  ;;  %1538 = vmatprep.subr.bf16.mxu1 %v2480_v7  ;;  %v2547_v5 = vld [vmem:[#allocation8 + $0x8] sm:$0xff]   ;;  %v2549_v7 = vld [vmem:[#allocation8 + $0x50] sm:$0xff]  }
 0x194   :  { %v2548_v6 = vld [vmem:[#allocation8 + $0x88] sm:$0xff]  }
 0x196   :  { %1457 = vmatpush1.bf16.msra.mxu0 %v2475_v9  ;;  %1539 = vmatpush1.bf16.msra.mxu1 %v2478_v10  ;;  %v2551_v9 = vld [vmem:[#allocation8 + $0x10] sm:$0xff]  }
 0x197   :  { %1458 = vmatprep.subr.bf16.mxu0 %v2483_v11  ;;  %1540 = vmatprep.subr.bf16.mxu1 %v2486_v12  ;;  %v2588_v56 = vpop.eup %2587  ;;  %v2552_v10 = vld [vmem:[#allocation8 + $0x90] sm:$0xff]   ;;  %v2553_v11 = vld [vmem:[#allocation8 + $0x58] sm:$0xff]  }
 0x198   :  { %v609_v60 = vmul.f32 %v2588_v56, %v2856_v13  ;;  %v2554_v12 = vld [vmem:[#allocation8 + $0xd8] sm:$0xff]  }
 0x199   :  { %v2555_v13 = vld [vmem:[#allocation8 + $0x18] sm:$0xff]  }
 0x19a   :  { %1459 = vmatpush1.bf16.msra.mxu0 %v2481_v15  ;;  %1541 = vmatpush1.bf16.msra.mxu1 %v2484_v16  ;;  %v613_v61 = vpack.c.bf16 %v609_v60, %v609_v60  ;;  %v2556_v15 = vld [vmem:[#allocation8 + $0x98] sm:$0xff]   ;;  %v2557_v16 = vld [vmem:[#allocation8 + $0x60] sm:$0xff]  }
 0x19b   :  { %1460 = vmatprep.subr.bf16.mxu0 %v2489_v17  ;;  %1542 = vmatprep.subr.bf16.mxu1 %v2492_v18  ;;  %v2558_v17 = vld [vmem:[#allocation8 + $0xe0] sm:$0xff]  }
 0x19c   :  { %v2559_v18 = vld [vmem:[#allocation8 + $0x20] sm:$0xff]  }
 0x19e   :  { %1461 = vmatpush1.bf16.msra.mxu0 %v2487_v19  ;;  %1543 = vmatpush1.bf16.msra.mxu1 %v2490_v20  ;;  %v2561_v19 = vld [vmem:[#allocation8 + $0x68] sm:$0xff]  }
 0x19f   :  { %1462 = vmatprep.subr.bf16.mxu0 %v2495_v21  ;;  %1544 = vmatprep.subr.bf16.mxu1 %v2498_v23  ;;  %v2562_v20 = vld [vmem:[#allocation8 + $0xe8] sm:$0xff]  }
 0x1a0   :  { %v2563_v21 = vld [vmem:[#allocation8 + $0x28] sm:$0xff]  }
 0x1a1   :  { %v2564_v23 = vld [vmem:[#allocation8 + $0xa8] sm:$0xff]  }
 0x1a2   :  { %1463 = vmatpush1.bf16.msra.mxu0 %v2493_v24  ;;  %1545 = vmatpush1.bf16.msra.mxu1 %v2496_v25  ;;  %v2565_v24 = vld [vmem:[#allocation8 + $0x70] sm:$0xff]  }
 0x1a3   :  { %1464 = vmatprep.subr.bf16.mxu0 %v2501_v27  ;;  %1546 = vmatprep.subr.bf16.mxu1 %v2504_v29  ;;  %v2566_v25 = vld [vmem:[#allocation8 + $0xf0] sm:$0xff]  }
 0x1a4   :  { %v2567_v27 = vld [vmem:[#allocation8 + $0x30] sm:$0xff]  }
 0x1a5   :  { %v2568_v29 = vld [vmem:[#allocation8 + $0xb0] sm:$0xff]  }
 0x1a6   :  { %1465 = vmatpush1.bf16.msra.mxu0 %v2499_v30  ;;  %1547 = vmatpush1.bf16.msra.mxu1 %v2502_v31  ;;  %v2569_v30 = vld [vmem:[#allocation8 + $0x78] sm:$0xff]  }
 0x1a7   :  { %1466 = vmatprep.subr.bf16.mxu0 %v2507_v32  ;;  %1548 = vmatprep.subr.bf16.mxu1 %v2510_v33  ;;  %v2570_v31 = vld [vmem:[#allocation8 + $0xf8] sm:$0xff]  }
 0x1a8   :  { %v2571_v32 = vld [vmem:[#allocation8 + $0x38] sm:$0xff]  }
 0x1a9   :  { %v2572_v33 = vld [vmem:[#allocation8 + $0xb8] sm:$0xff]  }
 0x1aa   :  { %1467 = vmatpush1.bf16.msra.mxu0 %v2505_v34  ;;  %1549 = vmatpush1.bf16.msra.mxu1 %v2508_v35  ;;  %v743_v34 = vld [vmem:[%s2888_s4] sm:$0xf] }
 0x1ab   :  { %1468 = vmatprep.subr.bf16.mxu0 %v2513_v37  ;;  %1550 = vmatprep.subr.bf16.mxu1 %v2516_v38  ;;  %v1388_v35 = vrot.slane %v743_v34, %v2833_v59  ;;  %v1396_v36 = vrot.slane %v743_v34, %v491_v2  ;;  %v1392_v37 = vrot.slane %v743_v34, %v2829_v28 }
 0x1ac   :  { %v1400_v38 = vrot.slane %v743_v34, %v495_v26 }
 0x1ae   :  { %1469 = vmatpush1.bf16.msra.mxu0 %v2511_v40  ;;  %1551 = vmatpush1.bf16.msra.mxu1 %v2514_v41 }
 0x1af   :  { %1470 = vmatprep.subr.bf16.mxu0 %v2519_v42  ;;  %1552 = vmatprep.subr.bf16.mxu1 %v2522_v43 }
 0x1b2   :  { %1471 = vmatpush1.bf16.msra.mxu0 %v2517_v44  ;;  %1553 = vmatpush1.bf16.msra.mxu1 %v2520_v45 }
 0x1b3   :  { %1472 = vmatprep.subr.bf16.mxu0 %v2525_v46  ;;  %1554 = vmatprep.subr.bf16.mxu1 %v2528_v47 }
 0x1b6   :  { %1473 = vmatpush1.bf16.msra.mxu0 %v2523_v48  ;;  %1555 = vmatpush1.bf16.msra.mxu1 %v2526_v49 }
 0x1b7   :  { %1474 = vmatprep.subr.bf16.mxu0 %v2531_v50  ;;  %1556 = vmatprep.subr.bf16.mxu1 %v2534_v51 }
 0x1ba   :  { %1475 = vmatpush1.bf16.msra.mxu0 %v2529_v52  ;;  %1557 = vmatpush1.bf16.msra.mxu1 %v2532_v53 }
 0x1bb   :  { %1476 = vmatprep.subr.bf16.mxu0 %v2537_v54  ;;  %1558 = vmatprep.subr.bf16.mxu1 %v2540_v55 }
 0x1be   :  { %1477 = vmatpush1.bf16.msra.mxu0 %v2535_v57  ;;  %1559 = vmatpush1.bf16.msra.mxu1 %v2538_v58 }
 0x1bf   :  { %2188 = vmatprep.subr.bf16.mxu0 %v2541_v62  ;;  %2210 = vmatprep.subr.bf16.mxu1 %v2542_v63 }
 0x1c1   :  { %1479 = vmatmul.mubr.bf16.vlgmr.msra.gmra.mrb[4].mxu0 %v613_v61  ;;  %1561 = vmatmul.mubr.bf16.vlgmr.msra.gmra.mrb[4].mxu1 %v613_v61 }
 0x1c2   :  { %2189 = vmatpush3.bf16.msra.mxu0 %v2543_v0  ;;  %2211 = vmatpush3.bf16.msra.mxu1 %v2544_v1 }
 0x1c3   :  { %2190 = vmatprep.subr.bf16.mxu0 %v2545_v3  ;;  %2212 = vmatprep.subr.bf16.mxu1 %v2546_v4 }
 0x1c6   :  { %2191 = vmatpush3.bf16.msra.mxu0 %v2547_v5  ;;  %2213 = vmatpush3.bf16.msra.mxu1 %v2548_v6 }
 0x1c7   :  { %2192 = vmatprep.subr.bf16.mxu0 %v2549_v7  ;;  %2214 = vmatprep.subr.bf16.mxu1 %v2550_v8 }
 0x1ca   :  { %2193 = vmatpush3.bf16.msra.mxu0 %v2551_v9  ;;  %2215 = vmatpush3.bf16.msra.mxu1 %v2552_v10  ;;  %v1665_v10 = vld [vmem:[%s2890_s6] sm:$0x1] }
 0x1cb   :  { %2194 = vmatprep.subr.bf16.mxu0 %v2553_v11  ;;  %2216 = vmatprep.subr.bf16.mxu1 %v2554_v12 }
 0x1ce   :  { %2195 = vmatpush3.bf16.msra.mxu0 %v2555_v13  ;;  %2217 = vmatpush3.bf16.msra.mxu1 %v2556_v15 }
 0x1cf   :  { %2196 = vmatprep.subr.bf16.mxu0 %v2557_v16  ;;  %2218 = vmatprep.subr.bf16.mxu1 %v2558_v17 }
 0x1d2   :  { %2197 = vmatpush3.bf16.msra.mxu0 %v2559_v18  ;;  %2219 = vmatpush3.bf16.msra.mxu1 %v2560_v14 }
 0x1d3   :  { %2198 = vmatprep.subr.bf16.mxu0 %v2561_v19  ;;  %2220 = vmatprep.subr.bf16.mxu1 %v2562_v20 }
 0x1d6   :  { %2199 = vmatpush3.bf16.msra.mxu0 %v2563_v21  ;;  %2221 = vmatpush3.bf16.msra.mxu1 %v2564_v23 }
 0x1d7   :  { %2200 = vmatprep.subr.bf16.mxu0 %v2565_v24  ;;  %2222 = vmatprep.subr.bf16.mxu1 %v2566_v25 }
 0x1da   :  { %2201 = vmatpush3.bf16.msra.mxu0 %v2567_v27  ;;  %2223 = vmatpush3.bf16.msra.mxu1 %v2568_v29 }
 0x1db   :  { %2202 = vmatprep.subr.bf16.mxu0 %v2569_v30  ;;  %2224 = vmatprep.subr.bf16.mxu1 %v2570_v31 }
 0x1de   :  { %2203 = vmatpush3.bf16.msra.mxu0 %v2571_v32  ;;  %2225 = vmatpush3.bf16.msra.mxu1 %v2572_v33 }
 0x294   :  { %v1480_v39 = vpop.f32.mrb[4].mxu0  ;;  %v1562_v40 = vpop.f32.mrb[4].mxu1 }
 0x295   :  { %v2232_v41 = vadd.f32 %v1480_v39, %v1388_v35  ;;  %v2234_v42 = vadd.f32 %v1562_v40, %v1396_v36  ;;  %v1482_v43 = vpop.f32.mrb[5].mxu0  ;;  %v1564_v44 = vpop.f32.mrb[5].mxu1 }
 0x296   :  { %v2233_v45 = vadd.f32 %v1482_v43, %v1392_v37  ;;  %v2235_v46 = vadd.f32 %v1564_v44, %v1400_v38  ;;  %v1484_v47 = vpop.f32.mrb[6].mxu0  ;;  %v1566_v48 = vpop.f32.mrb[6].mxu1 }
 0x297   :  { %v2152_v49 = vmul.f32 -1.442695, %v2232_v41  ;;  %v2154_v59 = vmul.f32 -1.442695, %v2234_v42  ;;  %v1485_v50 = vpop.f32.mrb[7].mxu0  ;;  %v1567_v51 = vpop.f32.mrb[7].mxu1 }
 0x298   :  { %v2153_v2 = vmul.f32 -1.442695, %v2233_v45  ;;  %v2155_v52 = vmul.f32 -1.442695, %v2235_v46 }
 0x299   :  { %2589 = vpow2.f32 %v2152_v49 }
 0x29a   :  { %2591 = vpow2.f32 %v2154_v59 }
 0x29b   :  { %2593 = vpow2.f32 %v2153_v2 }
 0x29c   :  { %2595 = vpow2.f32 %v2155_v52 }
 0x2a3   :  { %v2590_v22 = vpop.eup %2589 }
 0x2a4   :  { %v2592_v28 = vpop.eup %2591  ;;  %v1581_v26 = vadd.f32 1.0, %v2590_v22 }
 0x2a5   :  { %v2594_v53 = vpop.eup %2593  ;;  %v1583_v54 = vadd.f32 1.0, %v2592_v28 }
 0x2a6   :  { %v2596_v55 = vpop.eup %2595  ;;  %2597 = vrcp.f32 %v1581_v26  ;;  %v1582_v56 = vadd.f32 1.0, %v2594_v53 }
 0x2a7   :  { %2599 = vrcp.f32 %v1583_v54  ;;  %v1584_v57 = vadd.f32 1.0, %v2596_v55 }
 0x2a8   :  { %2601 = vrcp.f32 %v1582_v56 }
 0x2a9   :  { %2603 = vrcp.f32 %v1584_v57 }
 0x2b0   :  { %v2598_v58 = vpop.eup %2597 }
 0x2b1   :  { %v2600_v60 = vpop.eup %2599  ;;  %v1593_v62 = vmul.f32 %v2598_v58, %v2232_v41 }
 0x2b2   :  { %v2602_v61 = vpop.eup %2601  ;;  %v1595_v0 = vmul.f32 %v2600_v60, %v2234_v42 }
 0x2b3   :  { %v2604_v63 = vpop.eup %2603  ;;  %v1594_v1 = vmul.f32 %v2602_v61, %v2233_v45  ;;  %v1597_v5 = vpack.c.bf16 %v1593_v62, %v1593_v62 }
 0x2b4   :  { %v1596_v3 = vmul.f32 %v2604_v63, %v2235_v46  ;;  %v1599_v7 = vpack.c.bf16 %v1595_v0, %v1595_v0 }
 0x2b5   :  { %v1598_v4 = vpack.c.bf16 %v1594_v1, %v1594_v1 }
 0x2b6   :  { %v1600_v6 = vpack.c.bf16 %v1596_v3, %v1596_v3 }
 0x2b7   :  { %1890 = vmatprep.mubr.bf16.mxu0 %v1598_v4 }
 0x2b8   :  { %1930 = vmatprep.mubr.bf16.mxu1 %v1600_v6  ;;  %1891 = vmatmul.mubr.bf16.vlgmr.msra.gmra.mrb[8].mxu0 %v1597_v5 }
 0x2b9   :  { %1931 = vmatmul.mubr.bf16.vlgmr.msra.gmra.mrb[8].mxu1 %v1599_v7 }
 0x38b   :  { %v2204_v8 = vpop.f32.mrb[8].mxu0 }
 0x38c   :  { %v2226_v9 = vpop.f32.mrb[8].mxu1  ;;  %v2205_v11 = vpop.f32.mrb[9].mxu0 }
 0x38d   :  { %v2206_v12 = vadd.f32 %v2205_v11, %v2204_v8  ;;  %v2227_v13 = vpop.f32.mrb[9].mxu1  ;;  %v2207_v15 = vpop.f32.mrb[10].mxu0 }
 0x38e   :  { %v2228_v16 = vadd.f32 %v2227_v13, %v2226_v9  ;;  %v2229_v17 = vpop.f32.mrb[10].mxu1  ;;  %v2208_v18 = vpop.f32.mrb[11].mxu0 }
 0x38f   :  { %v1893_v14 = vadd.f32 %v2206_v12, %v1665_v10  ;;  %v2230_v19 = vpop.f32.mrb[11].mxu1 }
 0x391   :  { %v1933_v20 = vadd.f32 %v2228_v16, %v1893_v14 }
 0x393   :  { %1938 = vst [vmem:[#allocation10] sm:$0x1] %v1933_v20 }
 0x394   :  { %2704 = shalt.err (!%p2701_p8)
}
 0x395   :  { %s2705_s13 = scalar_lea.hbm %s2891_s7, 16 }
 0x396   :  { %p2706_p9 = scmp.ne.s32.totalorder %s2891_s7, %s2705_s13  ;;  %p2709_p10 = scmp.lt.u32.totalorder %s2705_s13, %s2891_s7 }
 0x398   :  { %p2711_p11 = pnand %p2709_p10, %p2706_p9 }
 0x39a   :  { %2714 = shalt.err (!%p2711_p11)
}
 0x39b   :  { %1948 = dma.vmem_to_hbm [thread:$0]  %s1946_s30, 16, %s2891_s7, [#allocation4]  }
 0x39c   :  { %2721 = dma.done.wait [#allocation4], 16  }
 0x39d   :  { %2722 = vsyncadd [#allocation4], 4294967280 }
 0x39e   :  { %1952 = vsyncpa [#allocation3], 1 }
 0x39f   :  { %1953 = vsyncpa [#allocation6], 1 }
 0x3a0   :  { %1954 = vsyncpa [#allocation9], 1 }
 0x3a1   :  { %1955 = vsyncpa [#allocation4], 1 }

</bundles_post_ra>
